<compile_context>
chip_gen: v7x
topology: tpu7x:2x2x1
jax: 0.10.0
libtpu: 0.0.40
codegen_flags: <defaults>
</compile_context>

<pallas_src>
import functools

import jax
import jax.numpy as jnp
from jax import lax
from jax.experimental import pallas as pl
from jax.experimental.pallas import tpu as pltpu


def _round_up(a: int, b: int) -> int:
    return (a + b - 1) // b * b


def mlp_kernel(x_ref, wup_ref, bup_ref, wdn_ref, bdn_ref, o_ref, acc_ref):
    """One (row-tile, hidden-tile) grid step.

    x_ref:   (tm, D)  f32 (cast to bf16 for the MXU)
    wup_ref: (th, D)  bf16     bup_ref: (1, th) f32
    wdn_ref: (D, th)  bf16     bdn_ref: (1, D)  f32
    o_ref:   (tm, D)  out      acc_ref: (tm, D) f32 VMEM scratch
    """
    h_idx = pl.program_id(1)

    # up projection chunk: contract D dims -> (tm, th), f32 accumulation on MXU
    h = lax.dot_general(
        x_ref[...].astype(wup_ref.dtype), wup_ref[...],
        dimension_numbers=(((1,), (1,)), ((), ())),
        preferred_element_type=jnp.float32)
    h = jnp.maximum(h + bup_ref[...], 0.0)          # bias + ReLU in f32

    # down projection chunk: contract th dims -> (tm, D)
    y = lax.dot_general(
        h.astype(wdn_ref.dtype), wdn_ref[...],
        dimension_numbers=(((1,), (1,)), ((), ())),
        preferred_element_type=jnp.float32)

    @pl.when(h_idx == 0)
    def _first():
        acc_ref[...] = y                            # no separate zero-init pass

    @pl.when(h_idx > 0)
    def _accum():
        acc_ref[...] += y

    @pl.when(h_idx == pl.num_programs(1) - 1)
    def _finalize():
        # TODO(synk): dropout is identity here (config.dropout=None / eval mode)
        o_ref[...] = (acc_ref[...] + bdn_ref[...]).astype(o_ref.dtype)


@functools.partial(jax.jit, static_argnames=("tm", "th"))
def mlp_pallas(x, w_up, b_up, w_down, b_down, *, tm=512, th=512):
    """x: [B, S, D].  w_up: [H, D] (PyTorch Linear layout), b_up: [H],
    w_down: [D, H], b_down: [D].  tm / th must be multiples of 128."""
    B, S, D = x.shape
    H = w_up.shape[0]
    M = B * S
    out_dtype = x.dtype
    compute_dtype = jnp.bfloat16

    # Row tile: big for MXU utilization + weight reuse, clamped for tiny inputs.
    tm_eff = min(tm, _round_up(M, 128))
    M_pad = _round_up(M, tm_eff)
    # Hidden tile: reduction axis, pipelined weight chunks.
    th_eff = min(th, _round_up(H, 128))
    H_pad = _round_up(H, th_eff)

    x2 = x.reshape(M, D)                              # stays f32; cast in-kernel
    if M_pad != M:
        x2 = jnp.pad(x2, ((0, M_pad - M), (0, 0)))

    # NOTE: in a real model, store weights in bf16 (and pre-padded) upstream so
    # these casts/pads happen once at load time, not per call.
    wup = w_up.astype(compute_dtype)                  # [H, D] -- no transpose
    wdn = w_down.astype(compute_dtype)                # [D, H] -- no transpose
    bup = b_up.astype(jnp.float32).reshape(1, H)
    bdn = b_down.astype(jnp.float32).reshape(1, D)
    if H_pad != H:
        # zero-padded hidden units give relu(0 + 0) = 0 and contribute nothing
        wup = jnp.pad(wup, ((0, H_pad - H), (0, 0)))
        wdn = jnp.pad(wdn, ((0, 0), (0, H_pad - H)))
        bup = jnp.pad(bup, ((0, 0), (0, H_pad - H)))

    n_m = pl.cdiv(M_pad, tm_eff)
    n_h = pl.cdiv(H_pad, th_eff)

    w_item = jnp.dtype(compute_dtype).itemsize
    cost = pl.CostEstimate(
        flops=4 * M_pad * D * H_pad,                  # two matmuls, 2 flops/MAC
        transcendentals=0,
        bytes_accessed=(M_pad * D * x2.dtype.itemsize          # x (read once)
                        + n_m * 2 * H_pad * D * w_item          # weights per row tile
                        + (H_pad + D) * 4                       # biases
                        + M_pad * D * jnp.dtype(out_dtype).itemsize))

    out = pl.pallas_call(
        mlp_kernel,
        out_shape=jax.ShapeDtypeStruct((M_pad, D), out_dtype),
        grid_spec=pltpu.PrefetchScalarGridSpec(
            num_scalar_prefetch=0,
            grid=(n_m, n_h),                          # reduction (hidden) axis last
            in_specs=[
                pl.BlockSpec((tm_eff, D), lambda i, h: (i, 0)),   # x rows (fetched once per i)
                pl.BlockSpec((th_eff, D), lambda i, h: (h, 0)),   # w_up chunk
                pl.BlockSpec((1, th_eff), lambda i, h: (0, h)),   # b_up chunk
                pl.BlockSpec((D, th_eff), lambda i, h: (0, h)),   # w_down chunk
                pl.BlockSpec((1, D),      lambda i, h: (0, 0)),   # b_down
            ],
            out_specs=pl.BlockSpec((tm_eff, D), lambda i, h: (i, 0)),
            scratch_shapes=[pltpu.VMEM((tm_eff, D), jnp.float32)],
        ),
        compiler_params=pltpu.CompilerParams(
            dimension_semantics=("parallel", "arbitrary"),
            vmem_limit_bytes=48 * 1024 * 1024),
        cost_estimate=cost,
    )(x2, wup, bup, wdn, bdn)

    if M_pad != M:
        out = out[:M]
    return out.reshape(B, S, D)


if __name__ == "__main__":
    def ref_mlp(x, w_up, b_up, w_down, b_down):
        h = jnp.maximum(x @ w_up.T + b_up, 0.0)
        return h @ w_down.T + b_down

    key = jax.random.PRNGKey(0)

    # second config exercises ragged M (row padding) and a multi-step hidden axis
    configs = [(2, 8, 128, 256), (2, 7, 128, 640)]
    for (batch, seq, d_model, hidden_dim) in configs:
        kx, k1, k2, k3, k4, key = jax.random.split(key, 6)
        x = jax.random.normal(kx, (batch, seq, d_model), dtype=jnp.float32)
        # PyTorch nn.Linear weight layout: [out_features, in_features]
        w_up = jax.random.normal(k1, (hidden_dim, d_model), dtype=jnp.float32) * 0.02
        b_up = jax.random.normal(k2, (hidden_dim,), dtype=jnp.float32) * 0.02
        w_down = jax.random.normal(k3, (d_model, hidden_dim), dtype=jnp.float32) * 0.02
        b_down = jax.random.normal(k4, (d_model,), dtype=jnp.float32) * 0.02

        out = mlp_pallas(x, w_up, b_up, w_down, b_down)
        out = jax.block_until_ready(out)

        y_ref = ref_mlp(x, w_up, b_up, w_down, b_down)
        assert out.shape == (batch, seq, d_model)
        # bf16 MXU inputs with f32 accumulation -> loose-but-tight-enough tolerance
        assert jnp.allclose(out, y_ref, atol=2e-2, rtol=2e-2), float(
            jnp.max(jnp.abs(out - y_ref)))

    print("KERNEL_OK")
</pallas_src>

<mosaic_0001>
module attributes {stable_mosaic.version = 11 : i64} {
  func.func @mlp_kernel(%arg0: i32, %arg1: i32, %arg2: memref<128x128xf32, #tpu.memory_space<vmem>>, %arg3: memref<256x128xbf16, #tpu.memory_space<vmem>>, %arg4: memref<1x256xf32, #tpu.memory_space<vmem>>, %arg5: memref<128x256xbf16, #tpu.memory_space<vmem>>, %arg6: memref<1x128xf32, #tpu.memory_space<vmem>>, %arg7: memref<128x128xf32, #tpu.memory_space<vmem>>, %arg8: memref<128x128xf32, #tpu.memory_space<vmem>>) attributes {dimension_semantics = [#tpu.dimension_semantics<parallel>, #tpu.dimension_semantics<arbitrary>], iteration_bounds = array<i64: 1, 1>, scalar_prefetch = 0 : i64, scratch_operands = 1 : i64, tpu.core_type = #tpu.core_type<tc>, window_params = [{transform_indices = @transform_0, window_bounds = array<i64: 128, 128>}, {transform_indices = @transform_1, window_bounds = array<i64: 256, 128>}, {transform_indices = @transform_2, window_bounds = array<i64: 1, 256>}, {transform_indices = @transform_3, window_bounds = array<i64: 128, 256>}, {pipeline_mode = #tpu.pipeline_mode<synchronous>, transform_indices = @transform_4, window_bounds = array<i64: 1, 128>}, {transform_indices = @transform_5, window_bounds = array<i64: 128, 128>}]} {
    %c0 = arith.constant 0 : index
    %c0_0 = arith.constant 0 : index
    %0 = vector.load %arg2[%c0, %c0_0] : memref<128x128xf32, #tpu.memory_space<vmem>>, vector<128x128xf32>
    %1 = arith.truncf %0 : vector<128x128xf32> to vector<128x128xbf16>
    %c0_1 = arith.constant 0 : index
    %c0_2 = arith.constant 0 : index
    %2 = vector.load %arg3[%c0_1, %c0_2] : memref<256x128xbf16, #tpu.memory_space<vmem>>, vector<256x128xbf16>
    %cst = arith.constant dense<0.000000e+00> : vector<128x256xf32>
    %3 = tpu.matmul %1, %2, %cst {dimension_numbers = #tpu.dot_dimension_numbers<[1], [1], [0], [0], [0, 0, 1, 0], [], []>} : vector<128x128xbf16>, vector<256x128xbf16>, vector<128x256xf32> -> vector<128x256xf32>
    %c0_3 = arith.constant 0 : index
    %c0_4 = arith.constant 0 : index
    %4 = vector.load %arg4[%c0_3, %c0_4] : memref<1x256xf32, #tpu.memory_space<vmem>>, vector<1x256xf32>
    %5 = vector.broadcast %4 : vector<1x256xf32> to vector<128x256xf32>
    %6 = arith.addf %3, %5 : vector<128x256xf32>
    %cst_5 = arith.constant 0.000000e+00 : f32
    %7 = vector.broadcast %cst_5 : f32 to vector<128x256xf32>
    %8 = arith.maximumf %6, %7 : vector<128x256xf32>
    %9 = arith.truncf %8 : vector<128x256xf32> to vector<128x256xbf16>
    %c0_6 = arith.constant 0 : index
    %c0_7 = arith.constant 0 : index
    %10 = vector.load %arg5[%c0_6, %c0_7] : memref<128x256xbf16, #tpu.memory_space<vmem>>, vector<128x256xbf16>
    %cst_8 = arith.constant dense<0.000000e+00> : vector<128x128xf32>
    %11 = tpu.matmul %9, %10, %cst_8 {dimension_numbers = #tpu.dot_dimension_numbers<[1], [1], [0], [0], [0, 0, 1, 0], [], []>} : vector<128x256xbf16>, vector<128x256xbf16>, vector<128x128xf32> -> vector<128x128xf32>
    %c0_i32 = arith.constant 0 : i32
    %12 = arith.cmpi eq, %arg1, %c0_i32 : i32
    %13 = arith.extui %12 : i1 to i32
    %c0_i32_9 = arith.constant 0 : i32
    %14 = arith.cmpi ne, %13, %c0_i32_9 : i32
    scf.if %14 {
      %c0_14 = arith.constant 0 : index
      %c0_15 = arith.constant 0 : index
      %21 = vector.load %arg8[%c0_14, %c0_15] : memref<128x128xf32, #tpu.memory_space<vmem>>, vector<128x128xf32>
      tpu.vector_store %arg8[%c0_14, %c0_15], %11 {strides = array<i32>} : memref<128x128xf32, #tpu.memory_space<vmem>>, vector<128x128xf32>,
    } else {
    }
    %c0_i32_10 = arith.constant 0 : i32
    %15 = arith.cmpi sgt, %arg1, %c0_i32_10 : i32
    %16 = arith.extui %15 : i1 to i32
    %c0_i32_11 = arith.constant 0 : i32
    %17 = arith.cmpi ne, %16, %c0_i32_11 : i32
    scf.if %17 {
      %c0_14 = arith.constant 0 : index
      %c0_15 = arith.constant 0 : index
      %21 = vector.load %arg8[%c0_14, %c0_15] : memref<128x128xf32, #tpu.memory_space<vmem>>, vector<128x128xf32>
      %22 = arith.addf %21, %11 : vector<128x128xf32>
      %c0_16 = arith.constant 0 : index
      %c0_17 = arith.constant 0 : index
      %23 = vector.load %arg8[%c0_16, %c0_17] : memref<128x128xf32, #tpu.memory_space<vmem>>, vector<128x128xf32>
      tpu.vector_store %arg8[%c0_16, %c0_17], %22 {strides = array<i32>} : memref<128x128xf32, #tpu.memory_space<vmem>>, vector<128x128xf32>,
    } else {
    }
    %c0_i32_12 = arith.constant 0 : i32
    %18 = arith.cmpi eq, %arg1, %c0_i32_12 : i32
    %19 = arith.extui %18 : i1 to i32
    %c0_i32_13 = arith.constant 0 : i32
    %20 = arith.cmpi ne, %19, %c0_i32_13 : i32
    scf.if %20 {
      %c0_14 = arith.constant 0 : index
      %c0_15 = arith.constant 0 : index
      %21 = vector.load %arg8[%c0_14, %c0_15] : memref<128x128xf32, #tpu.memory_space<vmem>>, vector<128x128xf32>
      %c0_16 = arith.constant 0 : index
      %c0_17 = arith.constant 0 : index
      %22 = vector.load %arg6[%c0_16, %c0_17] : memref<1x128xf32, #tpu.memory_space<vmem>>, vector<1x128xf32>
      %23 = vector.broadcast %22 : vector<1x128xf32> to vector<128x128xf32>
      %24 = arith.addf %21, %23 : vector<128x128xf32>
      %c0_18 = arith.constant 0 : index
      %c0_19 = arith.constant 0 : index
      %25 = vector.load %arg7[%c0_18, %c0_19] : memref<128x128xf32, #tpu.memory_space<vmem>>, vector<128x128xf32>
      tpu.vector_store %arg7[%c0_18, %c0_19], %24 {strides = array<i32>} : memref<128x128xf32, #tpu.memory_space<vmem>>, vector<128x128xf32>,
    } else {
    }
    return
  }
  func.func @transform_0(%arg0: i32, %arg1: i32) -> (i32, i32) {
    %c0_i32 = arith.constant 0 : i32
    %c0_i32_0 = arith.constant 0 : i32
    return %arg0, %c0_i32 : i32, i32
  }
  func.func @transform_1(%arg0: i32, %arg1: i32) -> (i32, i32) {
    %c0_i32 = arith.constant 0 : i32
    %c0_i32_0 = arith.constant 0 : i32
    return %arg1, %c0_i32 : i32, i32
  }
  func.func @transform_2(%arg0: i32, %arg1: i32) -> (i32, i32) {
    %c0_i32 = arith.constant 0 : i32
    %c0_i32_0 = arith.constant 0 : i32
    return %c0_i32, %arg1 : i32, i32
  }
  func.func @transform_3(%arg0: i32, %arg1: i32) -> (i32, i32) {
    %c0_i32 = arith.constant 0 : i32
    %c0_i32_0 = arith.constant 0 : i32
    return %c0_i32, %arg1 : i32, i32
  }
  func.func @transform_4(%arg0: i32, %arg1: i32) -> (i32, i32) {
    %c0_i32 = arith.constant 0 : i32
    %c0_i32_0 = arith.constant 0 : i32
    %c0_i32_1 = arith.constant 0 : i32
    return %c0_i32, %c0_i32_0 : i32, i32
  }
  func.func @transform_5(%arg0: i32, %arg1: i32) -> (i32, i32) {
    %c0_i32 = arith.constant 0 : i32
    %c0_i32_0 = arith.constant 0 : i32
    return %arg0, %c0_i32 : i32, i32
  }
}

</mosaic_0001>

<bundles_post_ra>
// kernel: mlp_pallas.1
= control target key start
LH: loop header
LB: loop body
LE: loop exit
PB: predicated region body
PF: predicated region fallthrough
CT: control target
= control target key end

     0   :  { %v79_v56 = vlaneseq  ;;  %s1060_s1 = inlined_call_operand.vmem [shape: bf16[256,128], index: 1, kind: input, shape index: {}]   ;;  %s1061_s0 = inlined_call_operand.vmem [shape: f32[128,128], index: 0, kind: input, shape index: {}]   ;;  %s1062_s3 = inlined_call_operand.vmem [shape: bf16[128,256], index: 3, kind: input, shape index: {}]   ;;  %s1063_s2 = inlined_call_operand.vmem [shape: f32[1,256], index: 2, kind: input, shape index: {}]   ;;  %s1064_s4 = inlined_call_operand.vmem [shape: f32[1,128], index: 4, kind: input, shape index: {}]   ;;  %s1065_s5 = inlined_call_operand.vmem [shape: f32[128,128], index: 5, kind: output, shape index: {}]  }
   0x1   :  { %v738_v0 = vld [vmem:[%s1060_s1 + $0x40] sm:$0xff]   ;;  %v740_v2 = vld [vmem:[%s1060_s1 + $0x48] sm:$0xff]   ;;  %v742_v4 = vld [vmem:[%s1060_s1 + $0x50] sm:$0xff]  }
   0x2   :  { %v739_v1 = vld [vmem:[%s1060_s1] sm:$0xff]   ;;  %706 = vmatprep.subr.bf16.mxu0 %v738_v0  ;;  %v741_v3 = vld [vmem:[%s1060_s1 + $0x8] sm:$0xff]   ;;  %v743_v5 = vld [vmem:[%s1060_s1 + $0x10] sm:$0xff]   ;;  %v80_v57 = vshrl.u32 %v79_v56, 7 }
   0x3   :  { %707 = vmatpush3.bf16.xpose.msra.mxu0 %v739_v1  ;;  %v744_v6 = vld [vmem:[%s1060_s1 + $0x58] sm:$0xff]   ;;  %v21_v7 = vld [vmem:[%s1061_s0] sm:$0xff]  ;;  %v22_v8 = vld [vmem:[%s1061_s0 + $0x8] sm:$0xff] }
   0x4   :  { %708 = vmatprep.subr.bf16.mxu0 %v740_v2  ;;  %v37_v9 = vpack.c.bf16 %v22_v8, %v21_v7  ;;  %v754_v10 = vld [vmem:[%s1062_s3 + $0x4] ss:$8 sps:$4 sm:$0xff]   ;;  %v756_v11 = vld [vmem:[%s1062_s3] ss:$8 sps:$4 sm:$0xff]   ;;  %v745_v12 = vld [vmem:[%s1060_s1 + $0x18] sm:$0xff]   ;;  %v81_v58 = vsub.s32 0, %v80_v57 }
   0x5   :  { %v757_v13 = vld [vmem:[%s1062_s3 + $0x14] ss:$8 sps:$4 sm:$0xff]   ;;  %v746_v14 = vld [vmem:[%s1060_s1 + $0x60] sm:$0xff]   ;;  %442 = vmatprep.subr.bf16.mxu1 %v754_v10  ;;  %v759_v15 = vld [vmem:[%s1062_s3 + $0x10] ss:$8 sps:$4 sm:$0xff]   ;;  %v85_v60 = vsub.s32 1, %v80_v57 }
   0x6   :  { %722 = vmatprep.mubr.bf16.mxu0 %v37_v9  ;;  %443 = vmatpush1.bf16.xpose.msra.mxu1 %v756_v11  ;;  %v760_v16 = vld [vmem:[%s1062_s3 + $0x24] ss:$8 sps:$4 sm:$0xff]   ;;  %v762_v19 = vld [vmem:[%s1062_s3 + $0x20] ss:$8 sps:$4 sm:$0xff]   ;;  %v763_v20 = vld [vmem:[%s1062_s3 + $0x34] ss:$8 sps:$4 sm:$0xff]  }
   0x7   :  { %444 = vmatprep.subr.bf16.mxu1 %v757_v13  ;;  %v747_v17 = vld [vmem:[%s1060_s1 + $0x20] sm:$0xff]   ;;  %v748_v18 = vld [vmem:[%s1060_s1 + $0x68] sm:$0xff]   ;;  %v750_v22 = vld [vmem:[%s1060_s1 + $0x70] sm:$0xff]  }
   0x8   :  { %v749_v21 = vld [vmem:[%s1060_s1 + $0x28] sm:$0xff]   ;;  %v765_v23 = vld [vmem:[%s1062_s3 + $0x30] ss:$8 sps:$4 sm:$0xff]   ;;  %v769_v28 = vld [vmem:[%s1062_s3 + $0x54] ss:$8 sps:$4 sm:$0xff]  }
   0x9   :  { %v766_v24 = vld [vmem:[%s1062_s3 + $0x44] ss:$8 sps:$4 sm:$0xff]   ;;  %v751_v25 = vld [vmem:[%s1060_s1 + $0x30] sm:$0xff]   ;;  %v752_v26 = vld [vmem:[%s1060_s1 + $0x78] sm:$0xff]  }
   0xa   :  { %v768_v27 = vld [vmem:[%s1062_s3 + $0x40] ss:$8 sps:$4 sm:$0xff]   ;;  %v753_v29 = vld [vmem:[%s1060_s1 + $0x38] sm:$0xff]   ;;  %v23_v30 = vld [vmem:[%s1061_s0 + $0x10] sm:$0xff] }
   0xb   :  { %709 = vmatpush3.bf16.xpose.msra.mxu0 %v741_v3  ;;  %v24_v31 = vld [vmem:[%s1061_s0 + $0x18] sm:$0xff]  ;;  %v772_v33 = vld [vmem:[%s1062_s3 + $0x64] ss:$8 sps:$4 sm:$0xff]   ;;  %v774_v37 = vld [vmem:[%s1062_s3 + $0x60] ss:$8 sps:$4 sm:$0xff]  }
   0xc   :  { %710 = vmatprep.subr.bf16.mxu0 %v742_v4  ;;  %v771_v32 = vld [vmem:[%s1062_s3 + $0x50] ss:$8 sps:$4 sm:$0xff]   ;;  %v38_v34 = vpack.c.bf16 %v24_v31, %v23_v30  ;;  %v25_v35 = vld [vmem:[%s1061_s0 + $0x20] sm:$0xff]  ;;  %v26_v36 = vld [vmem:[%s1061_s0 + $0x28] sm:$0xff] }
   0xd   :  { %v39_v38 = vpack.c.bf16 %v26_v36, %v25_v35  ;;  %v27_v39 = vld [vmem:[%s1061_s0 + $0x30] sm:$0xff]  ;;  %v28_v40 = vld [vmem:[%s1061_s0 + $0x38] sm:$0xff]  ;;  %v29_v42 = vld [vmem:[%s1061_s0 + $0x40] sm:$0xff] }
   0xe   :  { %445 = vmatpush1.bf16.xpose.msra.mxu1 %v759_v15  ;;  %v40_v41 = vpack.c.bf16 %v28_v40, %v27_v39  ;;  %v30_v43 = vld [vmem:[%s1061_s0 + $0x48] sm:$0xff]  ;;  %v31_v45 = vld [vmem:[%s1061_s0 + $0x50] sm:$0xff]  ;;  %v32_v46 = vld [vmem:[%s1061_s0 + $0x58] sm:$0xff] }
   0xf   :  { %446 = vmatprep.subr.bf16.mxu1 %v760_v16  ;;  %v41_v44 = vpack.c.bf16 %v30_v43, %v29_v42  ;;  %v42_v47 = vpack.c.bf16 %v32_v46, %v31_v45  ;;  %v33_v48 = vld [vmem:[%s1061_s0 + $0x60] sm:$0xff]  ;;  %v34_v49 = vld [vmem:[%s1061_s0 + $0x68] sm:$0xff]  ;;  %v35_v51 = vld [vmem:[%s1061_s0 + $0x70] sm:$0xff] }
  0x10   :  { %v43_v50 = vpack.c.bf16 %v34_v49, %v33_v48  ;;  %v36_v52 = vld [vmem:[%s1061_s0 + $0x78] sm:$0xff]  ;;  %v77_v59 = vld [vmem:[%s1063_s2] sm:$0x3] }
  0x11   :  { %v44_v53 = vpack.c.bf16 %v36_v52, %v35_v51  ;;  %v775_v54 = vld [vmem:[%s1062_s3 + $0x74] ss:$8 sps:$4 sm:$0xff]   ;;  %v777_v55 = vld [vmem:[%s1062_s3 + $0x70] ss:$8 sps:$4 sm:$0xff]   ;;  %v955_v61 = vrot.slane %v77_v59, %v81_v58  ;;  %v957_v62 = vrot.slane %v77_v59, %v85_v60 }
  0x13   :  { %711 = vmatpush3.bf16.xpose.msra.mxu0 %v743_v5 }
  0x14   :  { %712 = vmatprep.subr.bf16.mxu0 %v744_v6 }
  0x16   :  { %447 = vmatpush1.bf16.xpose.msra.mxu1 %v762_v19 }
  0x17   :  { %448 = vmatprep.subr.bf16.mxu1 %v763_v20 }
  0x1b   :  { %713 = vmatpush3.bf16.xpose.msra.mxu0 %v745_v12 }
  0x1c   :  { %714 = vmatprep.subr.bf16.mxu0 %v746_v14 }
  0x1e   :  { %449 = vmatpush1.bf16.xpose.msra.mxu1 %v765_v23 }
  0x1f   :  { %450 = vmatprep.subr.bf16.mxu1 %v766_v24 }
  0x23   :  { %715 = vmatpush3.bf16.xpose.msra.mxu0 %v747_v17 }
  0x24   :  { %716 = vmatprep.subr.bf16.mxu0 %v748_v18 }
  0x26   :  { %451 = vmatpush1.bf16.xpose.msra.mxu1 %v768_v27 }
  0x27   :  { %452 = vmatprep.subr.bf16.mxu1 %v769_v28 }
  0x2b   :  { %717 = vmatpush3.bf16.xpose.msra.mxu0 %v749_v21 }
  0x2c   :  { %718 = vmatprep.subr.bf16.mxu0 %v750_v22 }
  0x2e   :  { %453 = vmatpush1.bf16.xpose.msra.mxu1 %v771_v32 }
  0x2f   :  { %454 = vmatprep.subr.bf16.mxu1 %v772_v33 }
  0x33   :  { %719 = vmatpush3.bf16.xpose.msra.mxu0 %v751_v25 }
  0x34   :  { %720 = vmatprep.subr.bf16.mxu0 %v752_v26 }
  0x36   :  { %455 = vmatpush1.bf16.xpose.msra.mxu1 %v774_v37 }
  0x37   :  { %456 = vmatprep.subr.bf16.mxu1 %v775_v54 }
  0x3b   :  { %721 = vmatpush3.bf16.xpose.msra.mxu0 %v753_v29 }
  0x3e   :  { %457 = vmatpush1.bf16.xpose.msra.mxu1 %v777_v55 }
  0x42   :  { %723 = vmatmul.mubr.bf16.vlgmr.msra.gmra.mrb[0].mxu0 %v37_v9 }
  0x43   :  { %724 = vmatprep.mubr.bf16.mxu0 %v38_v34 }
  0x4a   :  { %725 = vmatmul.mubr.bf16.gmra.mrb[4].mxu0 %v38_v34 }
  0x4b   :  { %726 = vmatprep.mubr.bf16.mxu0 %v39_v38 }
  0x52   :  { %727 = vmatmul.mubr.bf16.gmra.mrb[8].mxu0 %v39_v38 }
  0x53   :  { %728 = vmatprep.mubr.bf16.mxu0 %v40_v41 }
  0x5a   :  { %729 = vmatmul.mubr.bf16.gmra.mrb[12].mxu0 %v40_v41 }
  0x5b   :  { %730 = vmatprep.mubr.bf16.mxu0 %v41_v44 }
  0x62   :  { %731 = vmatmul.mubr.bf16.gmra.mrb[16].mxu0 %v41_v44 }
  0x63   :  { %732 = vmatprep.mubr.bf16.mxu0 %v42_v47 }
  0x6a   :  { %733 = vmatmul.mubr.bf16.gmra.mrb[20].mxu0 %v42_v47 }
  0x6b   :  { %734 = vmatprep.mubr.bf16.mxu0 %v43_v50 }
  0x72   :  { %735 = vmatmul.mubr.bf16.gmra.mrb[24].mxu0 %v43_v50 }
  0x73   :  { %736 = vmatprep.mubr.bf16.mxu0 %v44_v53 }
  0x7a   :  { %737 = vmatmul.mubr.bf16.gmra.mrb[28].mxu0 %v44_v53 }
 0x115   :  { %v219_v63 = vpop.f32.mrb[0].mxu0 }
 0x116   :  { %v220_v0 = vadd.f32 %v219_v63, %v955_v61  ;;  %v221_v1 = vpop.f32.mrb[1].mxu0 }
 0x117   :  { %v222_v2 = vadd.f32 %v221_v1, %v957_v62  ;;  %v223_v3 = vpop.f32.mrb[2].mxu0 }
 0x118   :  { %v224_v4 = vadd.f32 %v223_v3, %v955_v61  ;;  %v225_v5 = vpop.f32.mrb[3].mxu0  ;;  %v298_v7 = vmax.f32 %v220_v0, 0.0 }
 0x119   :  { %v226_v6 = vadd.f32 %v225_v5, %v957_v62  ;;  %v299_v9 = vmax.f32 %v222_v2, 0.0 }
 0x11a   :  { %v300_v8 = vmax.f32 %v224_v4, 0.0 }
 0x11b   :  { %v301_v10 = vmax.f32 %v226_v6, 0.0 }
 0x11c   :  { %v330_v11 = vpack.c.bf16 %v300_v8, %v298_v7 }
 0x11d   :  { %v229_v12 = vpop.f32.mrb[4].mxu0  ;;  %v331_v13 = vpack.c.bf16 %v301_v10, %v299_v9 }
 0x11e   :  { %v230_v14 = vadd.f32 %v229_v12, %v955_v61  ;;  %v231_v15 = vpop.f32.mrb[5].mxu0 }
 0x11f   :  { %v232_v16 = vadd.f32 %v231_v15, %v957_v62  ;;  %v233_v17 = vpop.f32.mrb[6].mxu0  ;;  %474 = vmatprep.mubr.bf16.mxu1 %v331_v13 }
 0x120   :  { %v234_v18 = vadd.f32 %v233_v17, %v955_v61  ;;  %v235_v19 = vpop.f32.mrb[7].mxu0  ;;  %475 = vmatmul.mubr.bf16.vlgmr.msra.gmra.mrb[0].mxu1 %v330_v11  ;;  %v302_v21 = vmax.f32 %v230_v14, 0.0 }
 0x121   :  { %v236_v20 = vadd.f32 %v235_v19, %v957_v62  ;;  %v303_v23 = vmax.f32 %v232_v16, 0.0 }
 0x122   :  { %v304_v22 = vmax.f32 %v234_v18, 0.0 }
 0x123   :  { %v305_v24 = vmax.f32 %v236_v20, 0.0 }
 0x124   :  { %v332_v25 = vpack.c.bf16 %v304_v22, %v302_v21 }
 0x125   :  { %v333_v26 = vpack.c.bf16 %v305_v24, %v303_v23  ;;  %v239_v27 = vpop.f32.mrb[8].mxu0 }
 0x126   :  { %v240_v28 = vadd.f32 %v239_v27, %v955_v61  ;;  %v241_v29 = vpop.f32.mrb[9].mxu0 }
 0x127   :  { %v242_v30 = vadd.f32 %v241_v29, %v957_v62  ;;  %v243_v31 = vpop.f32.mrb[10].mxu0  ;;  %482 = vmatprep.mubr.bf16.mxu1 %v333_v26 }
 0x128   :  { %v244_v32 = vadd.f32 %v243_v31, %v955_v61  ;;  %v245_v33 = vpop.f32.mrb[11].mxu0  ;;  %483 = vmatmul.mubr.bf16.gmra.mrb[4].mxu1 %v332_v25  ;;  %v306_v35 = vmax.f32 %v240_v28, 0.0 }
 0x129   :  { %v246_v34 = vadd.f32 %v245_v33, %v957_v62  ;;  %v307_v37 = vmax.f32 %v242_v30, 0.0 }
 0x12a   :  { %v308_v36 = vmax.f32 %v244_v32, 0.0 }
 0x12b   :  { %v309_v38 = vmax.f32 %v246_v34, 0.0 }
 0x12c   :  { %v334_v39 = vpack.c.bf16 %v308_v36, %v306_v35 }
 0x12d   :  { %v335_v40 = vpack.c.bf16 %v309_v38, %v307_v37  ;;  %v249_v41 = vpop.f32.mrb[12].mxu0 }
 0x12e   :  { %v250_v42 = vadd.f32 %v249_v41, %v955_v61  ;;  %v251_v43 = vpop.f32.mrb[13].mxu0 }
 0x12f   :  { %v252_v44 = vadd.f32 %v251_v43, %v957_v62  ;;  %v253_v45 = vpop.f32.mrb[14].mxu0  ;;  %490 = vmatprep.mubr.bf16.mxu1 %v335_v40 }
 0x130   :  { %v254_v46 = vadd.f32 %v253_v45, %v955_v61  ;;  %v255_v47 = vpop.f32.mrb[15].mxu0  ;;  %491 = vmatmul.mubr.bf16.gmra.mrb[8].mxu1 %v334_v39  ;;  %v310_v49 = vmax.f32 %v250_v42, 0.0 }
 0x131   :  { %v256_v48 = vadd.f32 %v255_v47, %v957_v62  ;;  %v311_v51 = vmax.f32 %v252_v44, 0.0 }
 0x132   :  { %v312_v50 = vmax.f32 %v254_v46, 0.0 }
 0x133   :  { %v313_v52 = vmax.f32 %v256_v48, 0.0 }
 0x134   :  { %v336_v53 = vpack.c.bf16 %v312_v50, %v310_v49  ;;  %v994_v49 = vld [vmem:[%s1064_s4] ss:$0 sm:$0xff] }
 0x135   :  { %v337_v54 = vpack.c.bf16 %v313_v52, %v311_v51  ;;  %v259_v55 = vpop.f32.mrb[16].mxu0 }
 0x136   :  { %v260_v56 = vadd.f32 %v259_v55, %v955_v61  ;;  %v261_v57 = vpop.f32.mrb[17].mxu0 }
 0x137   :  { %v262_v58 = vadd.f32 %v261_v57, %v957_v62  ;;  %v263_v59 = vpop.f32.mrb[18].mxu0  ;;  %498 = vmatprep.mubr.bf16.mxu1 %v337_v54 }
 0x138   :  { %v264_v60 = vadd.f32 %v263_v59, %v955_v61  ;;  %v265_v63 = vpop.f32.mrb[19].mxu0  ;;  %499 = vmatmul.mubr.bf16.gmra.mrb[12].mxu1 %v336_v53  ;;  %v314_v1 = vmax.f32 %v260_v56, 0.0 }
 0x139   :  { %v266_v0 = vadd.f32 %v265_v63, %v957_v62  ;;  %v315_v3 = vmax.f32 %v262_v58, 0.0 }
 0x13a   :  { %v316_v2 = vmax.f32 %v264_v60, 0.0 }
 0x13b   :  { %v317_v4 = vmax.f32 %v266_v0, 0.0 }
 0x13c   :  { %v338_v5 = vpack.c.bf16 %v316_v2, %v314_v1 }
 0x13d   :  { %v339_v6 = vpack.c.bf16 %v317_v4, %v315_v3  ;;  %v269_v7 = vpop.f32.mrb[20].mxu0 }
 0x13e   :  { %v270_v8 = vadd.f32 %v269_v7, %v955_v61  ;;  %v271_v9 = vpop.f32.mrb[21].mxu0 }
 0x13f   :  { %v272_v10 = vadd.f32 %v271_v9, %v957_v62  ;;  %v273_v11 = vpop.f32.mrb[22].mxu0  ;;  %506 = vmatprep.mubr.bf16.mxu1 %v339_v6 }
 0x140   :  { %v274_v12 = vadd.f32 %v273_v11, %v955_v61  ;;  %v275_v13 = vpop.f32.mrb[23].mxu0  ;;  %507 = vmatmul.mubr.bf16.gmra.mrb[16].mxu1 %v338_v5  ;;  %v318_v15 = vmax.f32 %v270_v8, 0.0 }
 0x141   :  { %v276_v14 = vadd.f32 %v275_v13, %v957_v62  ;;  %v319_v17 = vmax.f32 %v272_v10, 0.0 }
 0x142   :  { %v320_v16 = vmax.f32 %v274_v12, 0.0 }
 0x143   :  { %v321_v18 = vmax.f32 %v276_v14, 0.0 }
 0x144   :  { %v340_v19 = vpack.c.bf16 %v320_v16, %v318_v15 }
 0x145   :  { %v341_v20 = vpack.c.bf16 %v321_v18, %v319_v17  ;;  %v279_v21 = vpop.f32.mrb[24].mxu0 }
 0x146   :  { %v280_v22 = vadd.f32 %v279_v21, %v955_v61  ;;  %v281_v23 = vpop.f32.mrb[25].mxu0 }
 0x147   :  { %v282_v24 = vadd.f32 %v281_v23, %v957_v62  ;;  %v283_v25 = vpop.f32.mrb[26].mxu0  ;;  %514 = vmatprep.mubr.bf16.mxu1 %v341_v20 }
 0x148   :  { %v284_v26 = vadd.f32 %v283_v25, %v955_v61  ;;  %v285_v27 = vpop.f32.mrb[27].mxu0  ;;  %515 = vmatmul.mubr.bf16.gmra.mrb[20].mxu1 %v340_v19  ;;  %v322_v29 = vmax.f32 %v280_v22, 0.0 }
 0x149   :  { %v286_v28 = vadd.f32 %v285_v27, %v957_v62  ;;  %v323_v31 = vmax.f32 %v282_v24, 0.0 }
 0x14a   :  { %v324_v30 = vmax.f32 %v284_v26, 0.0 }
 0x14b   :  { %v325_v32 = vmax.f32 %v286_v28, 0.0 }
 0x14c   :  { %v342_v33 = vpack.c.bf16 %v324_v30, %v322_v29 }
 0x14d   :  { %v343_v34 = vpack.c.bf16 %v325_v32, %v323_v31  ;;  %v289_v35 = vpop.f32.mrb[28].mxu0 }
 0x14e   :  { %v290_v36 = vadd.f32 %v289_v35, %v955_v61  ;;  %v291_v37 = vpop.f32.mrb[29].mxu0 }
 0x14f   :  { %v292_v38 = vadd.f32 %v291_v37, %v957_v62  ;;  %v293_v39 = vpop.f32.mrb[30].mxu0  ;;  %522 = vmatprep.mubr.bf16.mxu1 %v343_v34 }
 0x150   :  { %v294_v40 = vadd.f32 %v293_v39, %v955_v61  ;;  %v295_v41 = vpop.f32.mrb[31].mxu0  ;;  %523 = vmatmul.mubr.bf16.gmra.mrb[24].mxu1 %v342_v33  ;;  %v326_v43 = vmax.f32 %v290_v36, 0.0 }
 0x151   :  { %v296_v42 = vadd.f32 %v295_v41, %v957_v62  ;;  %v327_v45 = vmax.f32 %v292_v38, 0.0 }
 0x152   :  { %v328_v44 = vmax.f32 %v294_v40, 0.0 }
 0x153   :  { %v329_v46 = vmax.f32 %v296_v42, 0.0 }
 0x154   :  { %v344_v47 = vpack.c.bf16 %v328_v44, %v326_v43 }
 0x155   :  { %v345_v48 = vpack.c.bf16 %v329_v46, %v327_v45 }
 0x157   :  { %530 = vmatprep.mubr.bf16.mxu1 %v345_v48 }
 0x158   :  { %531 = vmatmul.mubr.bf16.gmra.mrb[28].mxu1 %v344_v47 }
 0x1f3   :  { %v476_v50 = vpop.f32.mrb[0].mxu1 }
 0x1f4   :  { %v637_v61 = vadd.f32 %v994_v49, %v476_v50  ;;  %v478_v51 = vpop.f32.mrb[1].mxu1 }
 0x1f5   :  { %v479_v52 = vpop.f32.mrb[2].mxu1 }
 0x1f6   :  { %653 = vst [vmem:[%s1065_s5] sm:$0xff] %v637_v61  ;;  %v638_v62 = vadd.f32 %v994_v49, %v479_v52  ;;  %v481_v53 = vpop.f32.mrb[3].mxu1 }
 0x1f8   :  { %654 = vst [vmem:[%s1065_s5 + $0x8] sm:$0xff] %v638_v62 }
 0x1fb   :  { %v484_v54 = vpop.f32.mrb[4].mxu1 }
 0x1fc   :  { %v639_v55 = vadd.f32 %v994_v49, %v484_v54  ;;  %v486_v56 = vpop.f32.mrb[5].mxu1 }
 0x1fd   :  { %v487_v57 = vpop.f32.mrb[6].mxu1 }
 0x1fe   :  { %655 = vst [vmem:[%s1065_s5 + $0x10] sm:$0xff] %v639_v55  ;;  %v640_v58 = vadd.f32 %v994_v49, %v487_v57  ;;  %v489_v59 = vpop.f32.mrb[7].mxu1 }
 0x200   :  { %656 = vst [vmem:[%s1065_s5 + $0x18] sm:$0xff] %v640_v58 }
 0x203   :  { %v492_v60 = vpop.f32.mrb[8].mxu1 }
 0x204   :  { %v641_v63 = vadd.f32 %v994_v49, %v492_v60  ;;  %v494_v0 = vpop.f32.mrb[9].mxu1 }
 0x205   :  { %v495_v1 = vpop.f32.mrb[10].mxu1 }
 0x206   :  { %657 = vst [vmem:[%s1065_s5 + $0x20] sm:$0xff] %v641_v63  ;;  %v642_v2 = vadd.f32 %v994_v49, %v495_v1  ;;  %v497_v3 = vpop.f32.mrb[11].mxu1 }
 0x208   :  { %658 = vst [vmem:[%s1065_s5 + $0x28] sm:$0xff] %v642_v2 }
 0x20b   :  { %v500_v4 = vpop.f32.mrb[12].mxu1 }
 0x20c   :  { %v643_v5 = vadd.f32 %v994_v49, %v500_v4  ;;  %v502_v6 = vpop.f32.mrb[13].mxu1 }
 0x20d   :  { %v503_v7 = vpop.f32.mrb[14].mxu1 }
 0x20e   :  { %659 = vst [vmem:[%s1065_s5 + $0x30] sm:$0xff] %v643_v5  ;;  %v644_v8 = vadd.f32 %v994_v49, %v503_v7  ;;  %v505_v9 = vpop.f32.mrb[15].mxu1 }
 0x210   :  { %660 = vst [vmem:[%s1065_s5 + $0x38] sm:$0xff] %v644_v8 }
 0x213   :  { %v508_v10 = vpop.f32.mrb[16].mxu1 }
 0x214   :  { %v645_v11 = vadd.f32 %v994_v49, %v508_v10  ;;  %v510_v12 = vpop.f32.mrb[17].mxu1 }
 0x215   :  { %v511_v13 = vpop.f32.mrb[18].mxu1 }
 0x216   :  { %661 = vst [vmem:[%s1065_s5 + $0x40] sm:$0xff] %v645_v11  ;;  %v646_v14 = vadd.f32 %v994_v49, %v511_v13  ;;  %v513_v15 = vpop.f32.mrb[19].mxu1 }
 0x218   :  { %662 = vst [vmem:[%s1065_s5 + $0x48] sm:$0xff] %v646_v14 }
 0x21b   :  { %v516_v16 = vpop.f32.mrb[20].mxu1 }
 0x21c   :  { %v647_v17 = vadd.f32 %v994_v49, %v516_v16  ;;  %v518_v18 = vpop.f32.mrb[21].mxu1 }
 0x21d   :  { %v519_v19 = vpop.f32.mrb[22].mxu1 }
 0x21e   :  { %663 = vst [vmem:[%s1065_s5 + $0x50] sm:$0xff] %v647_v17  ;;  %v648_v20 = vadd.f32 %v994_v49, %v519_v19  ;;  %v521_v21 = vpop.f32.mrb[23].mxu1 }
 0x220   :  { %664 = vst [vmem:[%s1065_s5 + $0x58] sm:$0xff] %v648_v20 }
 0x223   :  { %v524_v22 = vpop.f32.mrb[24].mxu1 }
 0x224   :  { %v649_v23 = vadd.f32 %v994_v49, %v524_v22  ;;  %v526_v24 = vpop.f32.mrb[25].mxu1 }
 0x225   :  { %v527_v25 = vpop.f32.mrb[26].mxu1 }
 0x226   :  { %665 = vst [vmem:[%s1065_s5 + $0x60] sm:$0xff] %v649_v23  ;;  %v650_v26 = vadd.f32 %v994_v49, %v527_v25  ;;  %v529_v27 = vpop.f32.mrb[27].mxu1 }
 0x228   :  { %666 = vst [vmem:[%s1065_s5 + $0x68] sm:$0xff] %v650_v26 }
 0x22b   :  { %v532_v28 = vpop.f32.mrb[28].mxu1 }
 0x22c   :  { %v651_v29 = vadd.f32 %v994_v49, %v532_v28  ;;  %v534_v30 = vpop.f32.mrb[29].mxu1 }
 0x22d   :  { %v535_v31 = vpop.f32.mrb[30].mxu1 }
 0x22e   :  { %667 = vst [vmem:[%s1065_s5 + $0x70] sm:$0xff] %v651_v29  ;;  %v652_v32 = vadd.f32 %v994_v49, %v535_v31  ;;  %v537_v33 = vpop.f32.mrb[31].mxu1 }
 0x230   :  { %668 = vst [vmem:[%s1065_s5 + $0x78] sm:$0xff] %v652_v32 }

</bundles_post_ra>
